<compile_context>
chip_gen: v7x
topology: tpu7x:2x2x1
jax: 0.10.0
libtpu: 0.0.40
codegen_flags: <defaults>
</compile_context>

<pallas_src>
import functools

import numpy as np
import jax
import jax.numpy as jnp
from jax.experimental import pallas as pl
from jax.experimental.pallas import tpu as pltpu


# ----------------------- host-side circuit algebra (one-time parameter prep) -----------------------

_I2 = np.eye(2, dtype=np.complex128)


def _rx(t):
    c, s = np.cos(t / 2.0), np.sin(t / 2.0)
    return np.array([[c, -1j * s], [-1j * s, c]], dtype=np.complex128)


def _ry(t):
    c, s = np.cos(t / 2.0), np.sin(t / 2.0)
    return np.array([[c, -s], [s, c]], dtype=np.complex128)


def _rz(t):
    return np.array([[np.exp(-1j * t / 2.0), 0], [0, np.exp(1j * t / 2.0)]],
                    dtype=np.complex128)


def _embed_1q(gate, wire, n):
    """Embed a 2x2 gate on `wire` (wire 0 = most-significant bit, PennyLane convention)."""
    ops = [_I2] * n
    ops[wire] = gate
    out = ops[0]
    for m in ops[1:]:
        out = np.kron(out, m)
    return out


def _cnot(control, target, n):
    D = 2 ** n
    U = np.zeros((D, D), dtype=np.complex128)
    for b in range(D):
        if (b >> (n - 1 - control)) & 1:
            U[b ^ (1 << (n - 1 - target)), b] = 1.0
        else:
            U[b, b] = 1.0
    return U


def build_circuit_unitary(qweights, n_qubits, n_qlayers):
    """Total unitary of the trainable part (everything after AngleEmbedding)."""
    D = 2 ** n_qubits
    U = np.eye(D, dtype=np.complex128)
    for layer in range(n_qlayers):
        for q in range(n_qubits):
            g = _rz(qweights[layer, q, 2]) @ _ry(qweights[layer, q, 1]) @ _rx(qweights[layer, q, 0])
            U = _embed_1q(g, q, n_qubits) @ U
        for q in range(n_qubits - 1):
            U = _cnot(q, q + 1, n_qubits) @ U
        U = _cnot(n_qubits - 1, 0, n_qubits) @ U
    return U


def prepare_inputs(wp, bias, qweights, n_qubits, n_qlayers, out_features):
    """One-time host-side parameter/table prep (numpy). Returns f32 arrays:
         wpa     [n, F+1]  : projection weight with the bias folded in as the last column
         w_eff   [2D, 2D]  : packed real-form circuit unitary (left-multiply form
                             [[ReU, -ImU], [ImU, ReU]]) with the AngleEmbedding
                             (-i)^popcount phases folded into its columns
         bits_f  [2D, n]   : bit of wire q in basis index k (Re/Im halves share low bits)
         zsign_t [out, 2D] : PauliZ sign rows (+1/-1), identical for both halves
       plus the complex unitary U (for the reference)."""
    D = 1 << n_qubits
    D2 = 2 * D
    wpa = np.concatenate([np.asarray(wp, np.float64),
                          np.asarray(bias, np.float64)[:, None]], axis=1).astype(np.float32)

    U = build_circuit_unitary(np.asarray(qweights, np.float64), n_qubits, n_qlayers)
    W = np.block([[U.real, -U.imag],
                  [U.imag,  U.real]])                                     # [2D, 2D]

    ks = np.arange(D2)
    shifts = n_qubits - 1 - np.arange(n_qubits)
    bits = (ks[:, None] >> shifts[None, :]) & 1                            # [2D, n] (low wire bits only)
    pc4 = bits.sum(axis=1) % 4
    re_tab = np.array([1.0, 0.0, -1.0, 0.0])
    im_tab = np.array([0.0, -1.0, 0.0, 1.0])
    phase = np.where(ks < D, re_tab[pc4], im_tab[pc4])                     # [2D]
    w_eff = (W * phase[None, :]).astype(np.float32)                        # fold phase into columns

    bits_f = bits.astype(np.float32)                                       # [2D, n]
    zsign_t = (1.0 - 2.0 * bits[:, :out_features].T).astype(np.float32)    # [out, 2D]
    return wpa, w_eff, bits_f, zsign_t, U


# ----------------------------------- Pallas kernel -----------------------------------

def quantum_head_kernel(x_t_ref, wpa_ref, wu_ref, bits_ref, zsign_ref, o_ref):
    """Lane-dense (batch-on-lanes) forward.

    x_t_ref:   [F+1, blk]  features^T with a trailing ones row (bias via matmul)
    wpa_ref:   [n, F+1]    projection weight, bias folded as last column
    wu_ref:    [2D, 2D]    packed real-form circuit unitary, embedding phases folded in
    bits_ref:  [2D, n]     host-precomputed bit table (0./1.)
    zsign_ref: [out, 2D]   host-precomputed PauliZ sign rows (+1/-1)
    o_ref:     [out, blk]  PauliZ expectation values (transposed)
    """
    x_t = x_t_ref[...]
    wpa = wpa_ref[...]
    n_qubits = wpa.shape[0]

    # Linear projection (bias comes from the ones row): angles^T = [n, blk].
    angles_t = jnp.dot(wpa, x_t, preferred_element_type=jnp.float32)
    half = 0.5 * angles_t
    c = jnp.cos(half)                                        # [n, blk]
    s = jnp.sin(half)                                        # [n, blk]

    # AngleEmbedding magnitudes over the doubled basis (rows = [Re half | Im half]):
    # mag[k, b] = prod_q (bit_q(k) ? sin : cos).  The Re/Im half bit never aliases the
    # low wire bits, so both halves share the same magnitudes.
    bits = bits_ref[...]                                     # [2D, n]
    mag = None
    for q in range(n_qubits):                                # tiny static loop
        cq = c[q:q + 1, :]                                   # [1, blk]  (sublane slice)
        sq = s[q:q + 1, :]
        bq = bits[:, q:q + 1]                                # [2D, 1]
        fac = cq + (sq - cq) * bq                            # [2D, blk]
        mag = fac if mag is None else mag * fac

    # Circuit unitary with the (-i)^popcount phases folded into its columns:
    # psi_cat = [Re(psi); Im(psi)] stacked on rows, via a single MXU matmul.
    psi_cat = jnp.dot(wu_ref[...], mag, preferred_element_type=jnp.float32)   # [2D, blk]
    sq_amp = psi_cat * psi_cat

    # PauliZ expectations; Re^2 and Im^2 halves sum automatically inside the matmul.
    o_ref[...] = jnp.dot(zsign_ref[...], sq_amp, preferred_element_type=jnp.float32)


def _pick_block_b(B, block_b_max):
    """Batch tile: >=512 rows (amortize ~0.35us/step), <=block_b_max (VMEM),
    and aim for >=8 grid steps so both v7x TensorCores stay busy."""
    tgt = max(512, pl.cdiv(B, 8))
    tgt = min(block_b_max, tgt)
    return pl.cdiv(tgt, 128) * 128          # lane-dense multiple of 128


@functools.partial(jax.jit, static_argnames=("block_b", "gridded_min_b"))
def quantum_head_forward(x, wpa, w_eff, bits_f, zsign_t, *, block_b=4096, gridded_min_b=1024):
    B, F = x.shape
    n_qubits = wpa.shape[0]
    out_features = zsign_t.shape[0]
    if out_features > n_qubits:
        raise ValueError("out_features must be <= n_qubits (PauliZ measured on existing wires)")

    # Put the batch on the lane axis; append a ones row so the bias is part of the matmul.
    x_aug = jnp.concatenate([x, jnp.ones((B, 1), x.dtype)], axis=1)         # [B, F+1]

    if B < gridded_min_b:
        # Tiny batch: single un-gridded invocation; launch + weight DMA dominates.
        out_t = pl.pallas_call(
            quantum_head_kernel,
            out_shape=jax.ShapeDtypeStruct((out_features, B), jnp.float32),
            in_specs=[pl.BlockSpec(memory_space=pltpu.MemorySpace.VMEM)] * 5,
            out_specs=pl.BlockSpec(memory_space=pltpu.MemorySpace.VMEM),
        )(x_aug.T, wpa, w_eff, bits_f, zsign_t)
        return out_t.T

    # Large batch: lane-dense batch tiles, padded to a multiple of the tile, "parallel"
    # grid axis (2 TCs on v7x); parameters/tables stay resident via constant index maps.
    bb = _pick_block_b(B, block_b)
    grid_b = pl.cdiv(B, bb)
    b_pad = grid_b * bb
    x_t = jnp.pad(x_aug, ((0, b_pad - B), (0, 0))).T                        # [F+1, B_pad]

    out_t = pl.pallas_call(
        quantum_head_kernel,
        out_shape=jax.ShapeDtypeStruct((out_features, b_pad), jnp.float32),
        grid=(grid_b,),
        in_specs=[
            pl.BlockSpec((F + 1, bb), lambda i: (0, i)),
            pl.BlockSpec(wpa.shape, lambda i: (0, 0)),
            pl.BlockSpec(w_eff.shape, lambda i: (0, 0)),
            pl.BlockSpec(bits_f.shape, lambda i: (0, 0)),
            pl.BlockSpec(zsign_t.shape, lambda i: (0, 0)),
        ],
        out_specs=pl.BlockSpec((out_features, bb), lambda i: (0, i)),
        compiler_params=pltpu.CompilerParams(
            dimension_semantics=("parallel",),
            vmem_limit_bytes=32 * 1024 * 1024,
        ),
    )(x_t, wpa, w_eff, bits_f, zsign_t)
    return out_t[:, :B].T


# ----------------------------------- reference + driver -----------------------------------

def reference_forward(x, wp, bias, U, n_qubits, out_features):
    """Pure numpy complex statevector reference."""
    angles = x @ wp.T + bias                                 # [B, n]
    B = x.shape[0]
    D = 2 ** n_qubits
    out = np.zeros((B, out_features), dtype=np.float64)
    for b in range(B):
        psi0 = np.array([1.0 + 0.0j])
        for q in range(n_qubits):
            t = angles[b, q]
            psi0 = np.kron(psi0, np.array([np.cos(t / 2.0), -1j * np.sin(t / 2.0)]))
        psi = U @ psi0
        probs = np.abs(psi) ** 2
        for i in range(out_features):
            sign = np.array([1.0 - 2.0 * ((k >> (n_qubits - 1 - i)) & 1) for k in range(D)])
            out[b, i] = probs @ sign
    return out


if __name__ == "__main__":
    # Small shapes consistent with the module.
    in_features, n_qubits, out_features, n_qlayers = 32, 4, 4, 2

    key = jax.random.PRNGKey(0)
    k_x1, k_x2, k_w, k_b, k_q = jax.random.split(key, 5)

    # nn.Linear(in_features, n_qubits): weight [n_qubits, in_features], bias [n_qubits]
    lim = 1.0 / np.sqrt(in_features)
    wp = jax.random.uniform(k_w, (n_qubits, in_features), jnp.float32, -lim, lim)
    bias = jax.random.uniform(k_b, (n_qubits,), jnp.float32, -lim, lim)
    # TorchLayer 'weights': (n_qlayers, n_qubits, 3), init uniform in [0, 2*pi)
    qweights = jax.random.uniform(k_q, (n_qlayers, n_qubits, 3), jnp.float32, 0.0, 2.0 * np.pi)

    # One-time host-side parameter prep (circuit folded into one unitary, tables built once).
    wpa, w_eff, bits_f, zsign_t, U = prepare_inputs(
        np.asarray(wp), np.asarray(bias), np.asarray(qweights),
        n_qubits, n_qlayers, out_features)
    wpa_j, w_eff_j, bits_j, zsign_j = map(jnp.asarray, (wpa, w_eff, bits_f, zsign_t))

    # --- small batch: single un-gridded invocation ---
    B1 = 8
    x1 = jax.random.normal(k_x1, (B1, in_features), dtype=jnp.float32)
    out1 = jax.block_until_ready(
        quantum_head_forward(x1, wpa_j, w_eff_j, bits_j, zsign_j))
    ref1 = reference_forward(np.asarray(x1, np.float64), np.asarray(wp, np.float64),
                             np.asarray(bias, np.float64), U, n_qubits, out_features)
    assert np.allclose(np.asarray(out1, np.float64), ref1, atol=1e-4), (out1, ref1)

    # --- gridded lane-dense path: non-divisible B exercises padding + batch tiling ---
    B2 = 300
    x2 = jax.random.normal(k_x2, (B2, in_features), dtype=jnp.float32)
    out2 = jax.block_until_ready(
        quantum_head_forward(x2, wpa_j, w_eff_j, bits_j, zsign_j,
                             block_b=256, gridded_min_b=1))
    ref2 = reference_forward(np.asarray(x2, np.float64), np.asarray(wp, np.float64),
                             np.asarray(bias, np.float64), U, n_qubits, out_features)
    assert np.allclose(np.asarray(out2, np.float64), ref2, atol=1e-4), (out2, ref2)

    print("KERNEL_OK")
</pallas_src>

<mosaic_0001>
module attributes {stable_mosaic.version = 11 : i64} {
  func.func @quantum_head_kernel(%arg0: memref<33x8xf32, #tpu.memory_space<vmem>>, %arg1: memref<4x33xf32, #tpu.memory_space<vmem>>, %arg2: memref<32x32xf32, #tpu.memory_space<vmem>>, %arg3: memref<32x4xf32, #tpu.memory_space<vmem>>, %arg4: memref<4x32xf32, #tpu.memory_space<vmem>>, %arg5: memref<4x8xf32, #tpu.memory_space<vmem>>) attributes {dimension_semantics = [], scalar_prefetch = 0 : i64, scratch_operands = 0 : i64, tpu.core_type = #tpu.core_type<tc>} {
    %c0 = arith.constant 0 : index
    %c0_0 = arith.constant 0 : index
    %0 = vector.load %arg0[%c0, %c0_0] : memref<33x8xf32, #tpu.memory_space<vmem>>, vector<33x8xf32>
    %c0_1 = arith.constant 0 : index
    %c0_2 = arith.constant 0 : index
    %1 = vector.load %arg1[%c0_1, %c0_2] : memref<4x33xf32, #tpu.memory_space<vmem>>, vector<4x33xf32>
    %cst = arith.constant dense<0.000000e+00> : vector<4x8xf32>
    %2 = tpu.matmul %1, %0, %cst {dimension_numbers = #tpu.dot_dimension_numbers<[1], [0], [0], [1], [0, 0, 1, 1], [], []>} : vector<4x33xf32>, vector<33x8xf32>, vector<4x8xf32> -> vector<4x8xf32>
    %cst_3 = arith.constant 5.000000e-01 : f32
    %3 = vector.broadcast %cst_3 : f32 to vector<4x8xf32>
    %4 = arith.mulf %3, %2 : vector<4x8xf32>
    %5 = math.cos %4 : vector<4x8xf32>
    %6 = math.sin %4 : vector<4x8xf32>
    %c0_4 = arith.constant 0 : index
    %c0_5 = arith.constant 0 : index
    %7 = vector.load %arg3[%c0_4, %c0_5] : memref<32x4xf32, #tpu.memory_space<vmem>>, vector<32x4xf32>
    %8 = vector.extract_strided_slice %5 {offsets = [0, 0], sizes = [1, 8], strides = [1, 1]} : vector<4x8xf32> to vector<1x8xf32>
    %9 = vector.extract_strided_slice %6 {offsets = [0, 0], sizes = [1, 8], strides = [1, 1]} : vector<4x8xf32> to vector<1x8xf32>
    %10 = vector.extract_strided_slice %7 {offsets = [0, 0], sizes = [32, 1], strides = [1, 1]} : vector<32x4xf32> to vector<32x1xf32>
    %11 = arith.subf %9, %8 : vector<1x8xf32>
    %12 = vector.broadcast %11 : vector<1x8xf32> to vector<32x8xf32>
    %13 = vector.broadcast %10 : vector<32x1xf32> to vector<32x8xf32>
    %14 = arith.mulf %12, %13 : vector<32x8xf32>
    %15 = vector.broadcast %8 : vector<1x8xf32> to vector<32x8xf32>
    %16 = arith.addf %15, %14 : vector<32x8xf32>
    %17 = vector.extract_strided_slice %5 {offsets = [1, 0], sizes = [1, 8], strides = [1, 1]} : vector<4x8xf32> to vector<1x8xf32>
    %18 = vector.extract_strided_slice %6 {offsets = [1, 0], sizes = [1, 8], strides = [1, 1]} : vector<4x8xf32> to vector<1x8xf32>
    %19 = vector.extract_strided_slice %7 {offsets = [0, 1], sizes = [32, 1], strides = [1, 1]} : vector<32x4xf32> to vector<32x1xf32>
    %20 = arith.subf %18, %17 : vector<1x8xf32>
    %21 = vector.broadcast %20 : vector<1x8xf32> to vector<32x8xf32>
    %22 = vector.broadcast %19 : vector<32x1xf32> to vector<32x8xf32>
    %23 = arith.mulf %21, %22 : vector<32x8xf32>
    %24 = vector.broadcast %17 : vector<1x8xf32> to vector<32x8xf32>
    %25 = arith.addf %24, %23 : vector<32x8xf32>
    %26 = arith.mulf %16, %25 : vector<32x8xf32>
    %27 = vector.extract_strided_slice %5 {offsets = [2, 0], sizes = [1, 8], strides = [1, 1]} : vector<4x8xf32> to vector<1x8xf32>
    %28 = vector.extract_strided_slice %6 {offsets = [2, 0], sizes = [1, 8], strides = [1, 1]} : vector<4x8xf32> to vector<1x8xf32>
    %29 = vector.extract_strided_slice %7 {offsets = [0, 2], sizes = [32, 1], strides = [1, 1]} : vector<32x4xf32> to vector<32x1xf32>
    %30 = arith.subf %28, %27 : vector<1x8xf32>
    %31 = vector.broadcast %30 : vector<1x8xf32> to vector<32x8xf32>
    %32 = vector.broadcast %29 : vector<32x1xf32> to vector<32x8xf32>
    %33 = arith.mulf %31, %32 : vector<32x8xf32>
    %34 = vector.broadcast %27 : vector<1x8xf32> to vector<32x8xf32>
    %35 = arith.addf %34, %33 : vector<32x8xf32>
    %36 = arith.mulf %26, %35 : vector<32x8xf32>
    %37 = vector.extract_strided_slice %5 {offsets = [3, 0], sizes = [1, 8], strides = [1, 1]} : vector<4x8xf32> to vector<1x8xf32>
    %38 = vector.extract_strided_slice %6 {offsets = [3, 0], sizes = [1, 8], strides = [1, 1]} : vector<4x8xf32> to vector<1x8xf32>
    %39 = vector.extract_strided_slice %7 {offsets = [0, 3], sizes = [32, 1], strides = [1, 1]} : vector<32x4xf32> to vector<32x1xf32>
    %40 = arith.subf %38, %37 : vector<1x8xf32>
    %41 = vector.broadcast %40 : vector<1x8xf32> to vector<32x8xf32>
    %42 = vector.broadcast %39 : vector<32x1xf32> to vector<32x8xf32>
    %43 = arith.mulf %41, %42 : vector<32x8xf32>
    %44 = vector.broadcast %37 : vector<1x8xf32> to vector<32x8xf32>
    %45 = arith.addf %44, %43 : vector<32x8xf32>
    %46 = arith.mulf %36, %45 : vector<32x8xf32>
    %c0_6 = arith.constant 0 : index
    %c0_7 = arith.constant 0 : index
    %47 = vector.load %arg2[%c0_6, %c0_7] : memref<32x32xf32, #tpu.memory_space<vmem>>, vector<32x32xf32>
    %cst_8 = arith.constant dense<0.000000e+00> : vector<32x8xf32>
    %48 = tpu.matmul %47, %46, %cst_8 {dimension_numbers = #tpu.dot_dimension_numbers<[1], [0], [0], [1], [0, 0, 1, 1], [], []>} : vector<32x32xf32>, vector<32x8xf32>, vector<32x8xf32> -> vector<32x8xf32>
    %49 = arith.mulf %48, %48 : vector<32x8xf32>
    %c0_9 = arith.constant 0 : index
    %c0_10 = arith.constant 0 : index
    %50 = vector.load %arg4[%c0_9, %c0_10] : memref<4x32xf32, #tpu.memory_space<vmem>>, vector<4x32xf32>
    %cst_11 = arith.constant dense<0.000000e+00> : vector<4x8xf32>
    %51 = tpu.matmul %50, %49, %cst_11 {dimension_numbers = #tpu.dot_dimension_numbers<[1], [0], [0], [1], [0, 0, 1, 1], [], []>} : vector<4x32xf32>, vector<32x8xf32>, vector<4x8xf32> -> vector<4x8xf32>
    %c0_12 = arith.constant 0 : index
    %c0_13 = arith.constant 0 : index
    %52 = vector.load %arg5[%c0_12, %c0_13] : memref<4x8xf32, #tpu.memory_space<vmem>>, vector<4x8xf32>
    tpu.vector_store %arg5[%c0_12, %c0_13], %51 {strides = array<i32>} : memref<4x8xf32, #tpu.memory_space<vmem>>, vector<4x8xf32>,
    return
  }
}

</mosaic_0001>

<bundles_post_ra>
// kernel: quantum_head_forward.1
= control target key start
LH: loop header
LB: loop body
LE: loop exit
PB: predicated region body
PF: predicated region fallthrough
CT: control target
= control target key end

     0   :  { %v807_v3 = vmov 0.0|0.0   ;;  %vm808_vm0 = vmmov 0   ;;  %v809_v6 = vmov 0.0   ;;  %v810_v9 = vmov 1   ;;  %s955_s0 = inlined_call_operand.vmem [shape: f32[33,8], index: 0, kind: input, shape index: {}]   ;;  %s956_s1 = inlined_call_operand.vmem [shape: f32[4,33], index: 1, kind: input, shape index: {}]   ;;  %s957_s2 = inlined_call_operand.vmem [shape: f32[32,32], index: 2, kind: input, shape index: {}]   ;;  %s958_s3 = inlined_call_operand.vmem [shape: f32[32,4], index: 3, kind: input, shape index: {}]   ;;  %s959_s4 = inlined_call_operand.vmem [shape: f32[4,32], index: 4, kind: input, shape index: {}]   ;;  %s960_s5 = inlined_call_operand.hbm [shape: f32[4,8], index: 5, kind: output, shape index: {}]  }
   0x1   :  { %v21_v0 = vld [vmem:[%s955_s0] sm:$0xff]  ;;  %v22_v1 = vld [vmem:[%s955_s0 + $0x8] sm:$0xff]  ;;  %v23_v2 = vld [vmem:[%s955_s0 + $0x10] sm:$0xff]  ;;  %730 = vmatprep.subr.bf16.mxu0 %v807_v3  ;;  %702 = vmatprep.mubr.msk.f32.mxu0 %vm808_vm0, %v809_v6 }
   0x2   :  { %v731_v4 = vpack.c.bf16 %v22_v1, %v21_v0  ;;  %v24_v5 = vld [vmem:[%s955_s0 + $0x18] sm:$0xff]  ;;  %v313_v7 = vld [vmem:[%s958_s3] sm:$0xff]  ;;  %769 = vset.pattern.permute.xlu1 %v810_v9 }
   0x3   :  { %v734_v8 = vpack.c.bf16 %v24_v5, %v23_v2 }
   0x4   :  { %732 = vmatpush3.bf16.msra.mxu0 %v731_v4 }
   0x5   :  { %10 = vsyncpa [#allocation3], 0  ;;  %733 = vmatprep.subr.bf16.mxu0 %v807_v3  ;;  %359 = vperm.xlu1 %769, %v313_v7   ;;  %v314_v10 = vld [vmem:[%s958_s3 + $0x8] sm:$0xff]  ;;  %v811_v11 = vmov 0   ;;  %v25_v12 = vld [vmem:[%s955_s0 + $0x20] sm:$0x1] }
   0x6   :  { %768 = vset.pattern.permute.xlu0 %v811_v11  ;;  %vm31_vm1 = vcmask 1040384   ;;  %v26_v13 = vld [vmem:[%s956_s1] sm:$0xf]  ;;  %vm27_vm2 = vcmask 269312   ;;  %v812_v14 = vmov 2   ;;  %v316_v15 = vld [vmem:[%s958_s3 + $0x18] sm:$0xff] }
   0x7   :  { %324 = vperm.xlu0 %768, %v313_v7   ;;  %v315_v16 = vld [vmem:[%s958_s3 + $0x10] sm:$0xff]  ;;  %v813_v17 = vmov 3   ;;  %v462_v18 = vld [vmem:[%s957_s2] sm:$0xff]  ;;  %vm466_vm3 = vcmask 261120   ;;  %v814_v32 = vmov 683565275  }
   0x8   :  { %735 = vmatpush3.bf16.msra.mxu0 %v734_v8  ;;  %713 = vmatprep.mubr.msk.f32.mxu1 %vm466_vm3, %v462_v18  ;;  %v815_v34 = vmov 2475754826   ;;  %v816_v37 = vmov 2131351028   ;;  %v817_v40 = vmov 2102212464  }
   0x9   :  { %700 = vmatprep.subr.mxu0 %v809_v6  ;;  %363 = vperm.xlu1 %769, %v314_v10   ;;  %v818_v43 = vmov 920167782   ;;  %v819_v46 = vmov 1326507024   ;;  %s820_s19 = smov [#allocation2]  }
   0xa   :  { %s650_s20 = sshll.u32 %s820_s19, 4  ;;  %s651_s20 = int_to_ptr.vmem [resolvable:$true] %s650_s20 }
   0xb   :  { %329 = vperm.xlu0 %768, %v314_v10   ;;  %s783_s21 = scalar_lea.vmem %s651_s20, 64  ;;  %p788_p1 = scmp.lt.s32.totalorder %s651_s20, %s651_s20 }
   0xc   :  { %701 = vmatpush3.msk.msra.mxu0 %vm31_vm1, %v25_v12  ;;  %p784_p0 = scmp.ne.s32.totalorder %s651_s20, %s783_s21  ;;  %p789_p2 = scmp.lt.s32.totalorder %s783_s21, %s783_s21 }
   0xd   :  { %703 = vmatmul.mubr.msk.f32.vlgmr.msra.gmra.mrb[0].mxu0 %vm27_vm2, %v26_v13  ;;  %770 = vset.pattern.permute.xlu1 %v812_v14 }
   0xe   :  { %399 = vperm.xlu1 %770, %v314_v10   ;;  %p790_p3 = por %p789_p2, %p788_p1 }
   0xf   :  { %339 = vperm.xlu0 %768, %v316_v15  }
  0x10   :  { %p791_p4 = pnand %p790_p3, %p784_p0 }
  0x12   :  { %771 = vset.pattern.permute.xlu1 %v811_v11 }
  0x13   :  { %334 = vperm.xlu1 %771, %v315_v16   ;;  %773 = vset.pattern.permute.xlu0 %v813_v17 }
  0x14   :  { %431 = vperm.xlu0 %773, %v313_v7  }
  0x17   :  { %772 = vset.pattern.permute.xlu1 %v810_v9 }
  0x18   :  { %367 = vperm.xlu1 %772, %v315_v16   ;;  %774 = vset.pattern.permute.xlu0 %v812_v14 }
  0x19   :  { %395 = vperm.xlu0 %774, %v313_v7  }
  0x1c   :  { %371 = vperm.xlu1 %772, %v316_v15  }
  0x1d   :  { %407 = vperm.xlu0 %774, %v316_v15  }
  0x20   :  { %775 = vset.pattern.permute.xlu1 %v813_v17 }
  0x21   :  { %435 = vperm.xlu1 %775, %v314_v10   ;;  %778 = vset.pattern.permute.xlu0 %v813_v17 }
  0x25   :  { %776 = vset.pattern.permute.xlu1 %v812_v14 }
  0x26   :  { %403 = vperm.xlu1 %776, %v315_v16  }
  0x2a   :  { %777 = vset.pattern.permute.xlu1 %v813_v17 }
  0x2b   :  { %439 = vperm.xlu1 %777, %v315_v16  }
  0x2f   :  { %443 = vperm.xlu1 %777, %v316_v15  }
  0x84   :  { %v905_v18 = vpop.permute.xlu1 %359 }
  0xe0   :  { %v101_v19 = vpop.f32.mrb[0].mxu0 }
  0xe1   :  { %v890_v20 = vmul.f32 0.5, %v101_v19  ;;  %v704_v21 = vpop.f32.mrb[1].mxu0 }
  0xe3   :  { %v109_v22 = vand.u32 2139095040, %v890_v20  ;;  %v106_v26 = vand.u32 2147483647, %v890_v20  ;;  %vm108_vm11 = vcmp.lt.s32.totalorder %v890_v20, 0 }
  0xe5   :  { %v110_v23 = vshrl.u32 %v109_v22, 23  ;;  %v113_v29 = vand.u32 8388607, %v106_v26  ;;  %vm107_vm12 = vcmp.le.f32.partialorder %v106_v26, 0.7853982 }
  0xe7   :  { %v660_v24 = vadd.s32 4294967169, %v110_v23  ;;  %v114_v48 = vor.u32 8388608, %v113_v29  ;;  %v907_v23 = vpop.permute.xlu1 %363 }
  0xe9   :  { %v116_v25 = vadd.s32 1, %v660_v24  ;;  %v154_v62 = vshll.u32 %v114_v48, 8 }
  0xeb   :  { %vm117_vm4 = vcmp.gt.s32.totalorder %v116_v25, 0 }
  0xec   :  { %v118_v27 = vsel %vm117_vm4, %v116_v25, 0 }
  0xed   :  { %v120_v28 = vand.u32 31, %v118_v27  ;;  %v119_v31 = vshrl.u32 %v118_v27, 5  ;;  %v909_v27 = vpop.permute.xlu1 %399 }
  0xef   :  { %v121_v30 = vsub.s32 32, %v120_v28  ;;  %v123_v33 = vshll.u32 %v814_v32, %v120_v28  ;;  %v126_v35 = vshll.u32 %v815_v34, %v120_v28  ;;  %v129_v39 = vshll.u32 %v816_v37, %v120_v28 }
  0xf0   :  { %v132_v42 = vshll.u32 %v817_v40, %v120_v28  ;;  %v135_v45 = vshll.u32 %v818_v43, %v120_v28  ;;  %vm138_vm5 = vcmp.lt.s32.totalorder %v119_v31, 1  ;;  %vm141_vm6 = vcmp.lt.s32.totalorder %v119_v31, 4 }
  0xf1   :  { %v124_v36 = vshrl.u32 %v815_v34, %v121_v30  ;;  %v127_v38 = vshrl.u32 %v816_v37, %v121_v30  ;;  %v130_v41 = vshrl.u32 %v817_v40, %v121_v30  ;;  %v133_v44 = vshrl.u32 %v818_v43, %v121_v30 }
  0xf2   :  { %v136_v47 = vshrl.u32 %v819_v46, %v121_v30  ;;  %v122_v57 = vshrl.u32 %v814_v32, %v121_v30  ;;  %vm140_vm7 = vcmp.lt.s32.totalorder %v119_v31, 3  ;;  %vm139_vm8 = vcmp.lt.s32.totalorder %v119_v31, 2 }
  0xf3   :  { %v125_v49 = vor.u32 %v124_v36, %v123_v33  ;;  %v128_v50 = vor.u32 %v127_v38, %v126_v35  ;;  %v131_v51 = vor.u32 %v130_v41, %v129_v39  ;;  %v134_v52 = vor.u32 %v133_v44, %v132_v42  ;;  %v912_v36 = vpop.permute.xlu1 %334  ;;  %v325_v44 = vpop.permute.xlu0 %324 }
  0xf4   :  { %v137_v53 = vor.u32 %v136_v47, %v135_v45 }
  0xf5   :  { %v143_v54 = vsel %vm141_vm6, %v131_v51, 2102212464  ;;  %v146_v55 = vsel %vm138_vm5, %v125_v49, %v128_v50  ;;  %v150_v56 = vsel %vm138_vm5, %v128_v50, %v131_v51  ;;  %v147_v58 = vsel %vm141_vm6, %v134_v52, 920167782 }
  0xf6   :  { %v151_v59 = vsel %vm141_vm6, %v137_v53, 1326507024  ;;  %v148_v60 = vsel %vm140_vm7, %v131_v51, %v147_v58  ;;  %v142_v63 = vsel %vm138_vm5, %v122_v57, %v125_v49  ;;  %v144_v0 = vsel %vm140_vm7, %v128_v50, %v143_v54 }
  0xf7   :  { %v152_v61 = vsel %vm140_vm7, %v134_v52, %v151_v59  ;;  %v149_v1 = vsel %vm139_vm8, %v146_v55, %v148_v60  ;;  %v145_v9 = vsel %vm139_vm8, %v142_v63, %v144_v0  ;;  %v368_v42 = vpop.permute.xlu1 %367  ;;  %v330_v50 = vpop.permute.xlu0 %329  ;;  %v318_v52 = vlaneseq }
  0xf8   :  { %v153_v2 = vsel %vm139_vm8, %v150_v56, %v152_v61  ;;  %v899_v7 = vmul.u32.u64.low %v154_v62, %v149_v1  ;;  %v900_v8 = vmul.u32.u64.high %v154_v62, %v149_v1, %v899_v7  ;;  %v161_v11 = vmul.u32 %v154_v62, %v145_v9 }
  0xf9   :  { %v896_v4 = vmul.u32.u64.low %v154_v62, %v153_v2  ;;  %v897_v5 = vmul.u32.u64.high %v154_v62, %v153_v2, %v896_v4  ;;  %v319_v56 = vshrl.u32 %v318_v52, 7  ;;  %vm198_vm5 = vweird.f32 %v890_v20 }
  0xfa   :  { %v164_v10 = vadd.s32 1, %v900_v8 }
  0xfb   :  { %vm163_vm9 = vc.u32 %v897_v5, %v899_v7  ;;  %v162_v28 = vadd.s32 %v899_v7, %v897_v5  ;;  %v372_v49 = vpop.permute.xlu1 %371  ;;  %v340_v57 = vpop.permute.xlu0 %339  ;;  %v356_v61 = vsub.s32 1, %v319_v56 }
  0xfc   :  { %v165_v12 = vsel %vm163_vm9, %v164_v10, %v900_v8  ;;  %v392_v8 = vsub.s32 2, %v319_v56 }
  0xfd   :  { %v166_v13 = vadd.s32 %v165_v12, %v161_v11  ;;  %v320_v11 = vsub.s32 0, %v319_v56  ;;  %v428_v12 = vsub.s32 3, %v319_v56 }
  0xff   :  { %v167_v14 = vadd.s32 536870912, %v166_v13  ;;  %v436_v53 = vpop.permute.xlu1 %435  ;;  %v432_v1 = vpop.permute.xlu0 %431 }
 0x101   :  { %v168_v15 = vshrl.u32 %v167_v14, 30 }
 0x103   :  { %v169_v16 = vshll.u32 %v168_v15, 30  ;;  %v192_v41 = vsub.s32 4, %v168_v15  ;;  %v404_v0 = vpop.permute.xlu1 %403 }
 0x105   :  { %v170_v17 = vsub.s32 %v166_v13, %v169_v16  ;;  %v193_v46 = vsel %vm108_vm11, %v192_v41, %v168_v15 }
 0x106   :  { %v195_v48 = vsel %vm107_vm12, 0, %v193_v46 }
 0x107   :  { %v172_v19 = vsub.s32 0, %v170_v17  ;;  %v302_v51 = vadd.s32 3, %v195_v48  ;;  %v199_v54 = vand.u32 3, %v195_v48 }
 0x109   :  { %v661_v21 = vmin.u32 %v172_v19, %v170_v17  ;;  %v303_v55 = vand.u32 3, %v302_v51  ;;  %vm204_vm13 = vcmp.eq.s32.totalorder %v199_v54, 2  ;;  %vm201_vm15 = vcmp.eq.s32.totalorder %v199_v54, 0  ;;  %v440_v19 = vpop.permute.xlu1 %439 }
 0x10a   :  { %vm200_vm2 = vcmp.lt.s32.totalorder %v199_v54, 2 }
 0x10b   :  { %v174_v22 = vclz %v661_v21  ;;  %vm308_vm14 = vcmp.eq.s32.totalorder %v303_v55, 2  ;;  %vm305_vm1 = vcmp.eq.s32.totalorder %v303_v55, 0  ;;  %vm304_vm4 = vcmp.lt.s32.totalorder %v303_v55, 2  ;;  %v396_v21 = vpop.permute.xlu0 %395 }
 0x10d   :  { %v662_v24 = vadd.s32 4294967294, %v174_v22  ;;  %v444_v51 = vpop.permute.xlu1 %443 }
 0x10f   :  { %vm663_vm10 = vcmp.lt.s32.totalorder %v662_v24, 0 }
 0x110   :  { %v177_v25 = vsel %vm663_vm10, 0, %v662_v24 }
 0x111   :  { %v178_v29 = vsub.s32 32, %v177_v25  ;;  %v182_v30 = vsub.s32 4294967266, %v177_v25  ;;  %v179_v31 = vshll.u32 %v170_v17, %v177_v25 }
 0x113   :  { %v180_v32 = vshrl.u32 %v162_v28, %v178_v29  ;;  %v183_v33 = vadd.s32 127, %v182_v30 }
 0x115   :  { %v181_v34 = vor.u32 %v180_v32, %v179_v31  ;;  %v184_v35 = vshll.u32 %v183_v33, 23 }
 0x117   :  { %v185_v37 = vor.u32 4788187, %v184_v35  ;;  %v188_v39 = vcvt.s32.f32 %v181_v34 }
 0x119   :  { %v186_v38 = vand.u32 2147483647, %v185_v37 }
 0x11b   :  { %v189_v40 = vmul.f32 %v188_v39, %v186_v38 }
 0x11d   :  { %v190_v43 = vxor.u32 2147483648, %v189_v40 }
 0x11f   :  { %v191_v45 = vsel %vm108_vm11, %v190_v43, %v189_v40 }
 0x120   :  { %v194_v47 = vsel %vm107_vm12, %v890_v20, %v191_v45 }
 0x121   :  { %779 = vcosq.f32 %v194_v47 }
 0x122   :  { %781 = vsinq.f32 %v194_v47 }
 0x12b   :  { %v780_v58 = vpop.eup %779 }
 0x12c   :  { %v782_v59 = vpop.eup %781  ;;  %v205_v60 = vxor.u32 2147483648, %v780_v58 }
 0x12d   :  { %v202_v26 = vxor.u32 2147483648, %v782_v59 }
 0x12e   :  { %v206_v62 = vsel %vm204_vm13, %v205_v60, %v782_v59  ;;  %v310_v63 = vsel %vm308_vm14, %v205_v60, %v782_v59 }
 0x12f   :  { %v203_v2 = vsel %vm201_vm15, %v780_v58, %v202_v26  ;;  %v307_v4 = vsel %vm305_vm1, %v780_v58, %v202_v26 }
 0x130   :  { %v207_v5 = vsel %vm200_vm2, %v203_v2, %v206_v62  ;;  %v311_v7 = vsel %vm304_vm4, %v307_v4, %v310_v63 }
 0x131   :  { %v208_v9 = vsel %vm198_vm5, nan, %v207_v5  ;;  %v312_v10 = vsel %vm198_vm5, nan, %v311_v7 }
 0x132   :  { %v317_v13 = vsub.f32 %v312_v10, %v208_v9  ;;  %v381_v15 = vrot.slane %v208_v9, %v356_v61  ;;  %v417_v22 = vrot.slane %v208_v9, %v392_v8  ;;  %v349_v24 = vrot.slane %v208_v9, %v320_v11  ;;  %v463_v10 = vld [vmem:[%s957_s2 + $0x8] sm:$0xff] }
 0x133   :  { %v453_v28 = vrot.slane %v208_v9, %v428_v12 }
 0x134   :  { %v357_v14 = vrot.slane %v317_v13, %v356_v61  ;;  %v393_v16 = vrot.slane %v317_v13, %v392_v8  ;;  %v321_v17 = vrot.slane %v317_v13, %v320_v11  ;;  %v429_v25 = vrot.slane %v317_v13, %v428_v12  ;;  %v464_v11 = vld [vmem:[%s957_s2 + $0x10] sm:$0xff]  ;;  %v465_v12 = vld [vmem:[%s957_s2 + $0x18] sm:$0xff] }
 0x136   :  { %v374_v20 = vmul.f32 %v905_v18, %v357_v14  ;;  %v375_v29 = vmul.f32 %v907_v23, %v357_v14  ;;  %v411_v30 = vmul.f32 %v909_v27, %v393_v16  ;;  %v344_v31 = vmul.f32 %v912_v36, %v321_v17  ;;  %v408_v27 = vpop.permute.xlu0 %407 }
 0x137   :  { %v342_v32 = vmul.f32 %v325_v44, %v321_v17  ;;  %v376_v33 = vmul.f32 %v368_v42, %v357_v14  ;;  %v343_v34 = vmul.f32 %v330_v50, %v321_v17  ;;  %v377_v35 = vmul.f32 %v372_v49, %v357_v14 }
 0x138   :  { %v382_v37 = vadd.f32 %v381_v15, %v374_v20  ;;  %v383_v38 = vadd.f32 %v381_v15, %v375_v29  ;;  %v419_v39 = vadd.f32 %v417_v22, %v411_v30  ;;  %v352_v40 = vadd.f32 %v349_v24, %v344_v31 }
 0x139   :  { %v350_v41 = vadd.f32 %v349_v24, %v342_v32  ;;  %v384_v43 = vadd.f32 %v381_v15, %v376_v33  ;;  %v351_v45 = vadd.f32 %v349_v24, %v343_v34  ;;  %v385_v46 = vadd.f32 %v381_v15, %v377_v35 }
 0x13a   :  { %v345_v47 = vmul.f32 %v340_v57, %v321_v17  ;;  %v447_v18 = vmul.f32 %v436_v53, %v429_v25  ;;  %v412_v48 = vmul.f32 %v404_v0, %v393_v16  ;;  %v446_v23 = vmul.f32 %v432_v1, %v429_v25 }
 0x13b   :  { %v386_v52 = vmul.f32 %v382_v37, %v350_v41  ;;  %v388_v36 = vmul.f32 %v384_v43, %v352_v40  ;;  %v387_v44 = vmul.f32 %v383_v38, %v351_v45  ;;  %v448_v42 = vmul.f32 %v440_v19, %v429_v25 }
 0x13c   :  { %v353_v50 = vadd.f32 %v349_v24, %v345_v47  ;;  %v455_v49 = vadd.f32 %v453_v28, %v447_v18  ;;  %v420_v54 = vadd.f32 %v417_v22, %v412_v48  ;;  %v454_v55 = vadd.f32 %v453_v28, %v446_v23 }
 0x13d   :  { %v456_v56 = vadd.f32 %v453_v28, %v448_v42  ;;  %v410_v58 = vmul.f32 %v396_v21, %v393_v16  ;;  %v449_v59 = vmul.f32 %v444_v51, %v429_v25  ;;  %v413_v60 = vmul.f32 %v408_v27, %v393_v16 }
 0x13e   :  { %v389_v26 = vmul.f32 %v385_v46, %v353_v50  ;;  %v424_v61 = vmul.f32 %v420_v54, %v388_v36  ;;  %v423_v57 = vmul.f32 %v419_v39, %v387_v44 }
 0x13f   :  { %v418_v53 = vadd.f32 %v417_v22, %v410_v58  ;;  %v457_v62 = vadd.f32 %v453_v28, %v449_v59  ;;  %v421_v63 = vadd.f32 %v417_v22, %v413_v60  ;;  %v568_v28 = vld [vmem:[%s959_s4] sm:$0xf] }
 0x140   :  { %v460_v0 = vmul.f32 %v456_v56, %v424_v61  ;;  %v459_v1 = vmul.f32 %v455_v49, %v423_v57 }
 0x141   :  { %v422_v2 = vmul.f32 %v418_v53, %v386_v52  ;;  %v425_v4 = vmul.f32 %v421_v63, %v389_v26 }
 0x143   :  { %v458_v5 = vmul.f32 %v454_v55, %v422_v2  ;;  %v461_v7 = vmul.f32 %v457_v62, %v425_v4 }
 0x145   :  { %v736_v8 = vpack.c.bf16 %v459_v1, %v458_v5  ;;  %v740_v9 = vpack.c.bf16 %v461_v7, %v460_v0 }
 0x147   :  { %737 = vmatprep.subr.bf16.mxu1 %v736_v8 }
 0x148   :  { %739 = vmatpush3.bf16.msra.mxu1 %v736_v8 }
 0x149   :  { %741 = vmatprep.subr.bf16.mxu1 %v740_v9 }
 0x14c   :  { %743 = vmatpush3.bf16.msra.mxu1 %v740_v9 }
 0x14d   :  { %744 = vmatprep.subr.bf16.mxu1 %v807_v3 }
 0x14f   :  { %714 = vmatmul.mubr.msk.f32.vlgmr.msra.gmra.mrb[0].mxu1 %vm466_vm3, %v463_v10 }
 0x150   :  { %716 = vmatprep.mubr.msk.f32.mxu1 %vm466_vm3, %v464_v11 }
 0x153   :  { %717 = vmatmul.mubr.msk.f32.gmra.mrb[2].mxu1 %vm466_vm3, %v465_v12 }
 0x154   :  { %727 = vmatprep.mubr.msk.f32.mxu1 %vm808_vm0, %v809_v6  ;;  %vm642_vm0 = vcmask 60416  }
 0x222   :  { %v715_v13 = vpop.f32.mrb[0].mxu1 }
 0x223   :  { %v565_v14 = vmul.f32 %v715_v13, %v715_v13  ;;  %v545_v15 = vpop.f32.mrb[1].mxu1 }
 0x224   :  { %v564_v16 = vmul.f32 %v545_v15, %v545_v15 }
 0x226   :  { %v745_v17 = vpack.c.bf16 %v565_v14, %v564_v16  ;;  %v718_v19 = vpop.f32.mrb[2].mxu1 }
 0x227   :  { %v567_v21 = vmul.f32 %v718_v19, %v718_v19  ;;  %v555_v22 = vpop.f32.mrb[3].mxu1 }
 0x228   :  { %v566_v24 = vmul.f32 %v555_v22, %v555_v22  ;;  %746 = vmatpush3.bf16.msra.mxu1 %v745_v17 }
 0x229   :  { %747 = vmatprep.subr.bf16.mxu1 %v807_v3 }
 0x22a   :  { %v748_v25 = vpack.c.bf16 %v567_v21, %v566_v24 }
 0x22c   :  { %749 = vmatpush3.bf16.msra.mxu1 %v748_v25 }
 0x22f   :  { %728 = vmatmul.mubr.msk.f32.vlgmr.msra.gmra.mrb[4].mxu1 %vm466_vm3, %v568_v28 }
 0x302   :  { %v638_v6 = vpop.f32.mrb[4].mxu1 }
 0x303   :  { %643 = vst.msk [vmem:[#allocation2] sm:$0xf] %vm642_vm0, %v638_v6  ;;  %v729_v20 = vpop.f32.mrb[5].mxu1 }
 0x304   :  { %794 = shalt.err (!%p791_p4)
}
 0x305   :  { %s795_s4 = scalar_lea.hbm %s960_s5, 64 }
 0x306   :  { %p796_p5 = scmp.ne.s32.totalorder %s960_s5, %s795_s4  ;;  %p799_p6 = scmp.lt.u32.totalorder %s795_s4, %s960_s5 }
 0x308   :  { %p801_p7 = pnand %p799_p6, %p796_p5 }
 0x30a   :  { %804 = shalt.err (!%p801_p7)
}
 0x30b   :  { %653 = dma.vmem_to_hbm [thread:$0]  %s651_s20, 64, %s960_s5, [#allocation3]  }
 0x30c   :  { %805 = dma.done.wait [#allocation3], 64  }
 0x30d   :  { %806 = vsyncadd [#allocation3], 4294967232 }
 0x30e   :  { %657 = vsyncpa [#allocation3], 1 }

</bundles_post_ra>
